<compile_context>
chip_gen: v7x
topology: tpu7x:2x2x1
jax: 0.10.0
libtpu: 0.0.40
codegen_flags: <defaults>
</compile_context>

<pallas_src>
import numpy as np
import jax
import jax.numpy as jnp
from jax.experimental import pallas as pl
from jax.experimental.pallas import tpu as pltpu

# ----------------------------- config ---------------------------------------
PAD_TOKEN_ID = 0
EOS_TOKEN_ID = 2
VOCAB = 64
MAX_SOURCE_LENGTH = 8   # L
HIDDEN = 32             # H  (config.hidden_size)
NUM_CLASS = 4           # C
BATCH = 2               # B

LANE = 128              # TPU lane width
SUBLANE = 8             # f32 sublane count
MAX_TB = 256            # rows per grid step (full MXU sublane occupancy)


def _round_up(x, m):
    return (x + m - 1) // m * m


# ----------------------------- Pallas kernel --------------------------------
def _head_kernel(vec_ref, w_ref, b_ref, logit_ref):
    """Classification head for one batch tile.

    vec_ref   : (TB, Hp) bf16   gathered last-<eos> hidden rows (padded).
    w_ref     : (Hp, Cp) bf16   classification weight (padded, transposed).
    b_ref     : (1, Cp)  f32    classification bias (padded).
    logit_ref : (TB, Cp) f32    output logits tile (lane-dense, full vregs).
    """
    logit_ref[...] = (
        jnp.dot(vec_ref[...], w_ref[...], preferred_element_type=jnp.float32)
        + b_ref[...]
    )


def classification_head(vec, w_t, bias):
    """logit = vec @ W + b as a single Pallas matmul kernel.

    vec : (B, H) f32  gathered last-<eos> hidden rows
    w_t : (H, C) f32  torch weight transposed
    bias: (1, C) f32
    """
    B, H = vec.shape
    C = w_t.shape[-1]

    Hp = _round_up(H, LANE)
    Cp = _round_up(C, LANE)
    Bp = _round_up(B, SUBLANE)
    TB = min(Bp, MAX_TB)
    Bp = _round_up(Bp, TB)
    num_blocks = Bp // TB

    # pad only the already-gathered (B, H) slab + weights; zeros are inert for
    # the kept columns.  bf16 operands halve matmul DMA bytes (native MXU in).
    vec_p = jnp.pad(vec.astype(jnp.float32),
                    ((0, Bp - B), (0, Hp - H))).astype(jnp.bfloat16)
    w_p = jnp.pad(w_t.astype(jnp.float32),
                  ((0, Hp - H), (0, Cp - C))).astype(jnp.bfloat16)
    b_p = jnp.pad(bias.astype(jnp.float32).reshape(1, C),
                  ((0, 0), (0, Cp - C)))

    cost = pl.CostEstimate(
        flops=2 * Bp * Hp * Cp,
        transcendentals=0,
        bytes_accessed=(vec_p.size * 2 + w_p.size * 2
                        + b_p.size * 4 + Bp * Cp * 4),
    )

    # split across TensorCores only when there are enough steps to amortize it
    dims = ("parallel",) if num_blocks >= 4 else ("arbitrary",)

    logit_p = pl.pallas_call(
        _head_kernel,
        out_shape=jax.ShapeDtypeStruct((Bp, Cp), jnp.float32),
        grid=(num_blocks,),
        in_specs=[
            pl.BlockSpec((TB, Hp), lambda i: (i, 0)),   # batch tile of rows
            pl.BlockSpec((Hp, Cp), lambda i: (0, 0)),   # weights resident
            pl.BlockSpec((1, Cp), lambda i: (0, 0)),    # bias resident
        ],
        out_specs=pl.BlockSpec((TB, Cp), lambda i: (i, 0)),
        compiler_params=pltpu.CompilerParams(dimension_semantics=dims),
        cost_estimate=cost,
    )(vec_p, w_p, b_p)

    return logit_p[:B, :C]


# ----------------------------- host-side validation -------------------------
def validate_eos_counts(source_ids):
    """Mirrors the PyTorch ValueError. MUST run outside jit/tracing."""
    ids = np.asarray(source_ids).reshape(-1, MAX_SOURCE_LENGTH)
    counts = (ids == EOS_TOKEN_ID).sum(axis=1)
    if len(np.unique(counts)) > 1:
        raise ValueError("All examples must have the same number of <eos> tokens.")
    if counts.min() == 0:
        raise ValueError("Every example must contain at least one <eos> token.")


# ----------------------------- wrapper (module forward) ---------------------
def codet5_classifier_forward(source_ids, embed_table, w_t, bias):
    """jit-safe forward. Call validate_eos_counts(source_ids) outside jit."""
    # source_ids.view(-1, max_source_length)
    source_ids = source_ids.reshape(-1, MAX_SOURCE_LENGTH).astype(jnp.int32)
    B, L = source_ids.shape

    # TODO(synk): stand-in for encoder(...)['decoder_hidden_states'][-1]
    hidden_states = embed_table[source_ids].astype(jnp.float32)  # (B, L, H)

    # last <eos> position per row — cheap (B, L) int work; clamp so rows with
    # no <eos> never produce a negative gather index under jit.
    pos = jnp.arange(L, dtype=jnp.int32)[None, :]
    last_idx = jnp.max(
        jnp.where(source_ids == EOS_TOKEN_ID, pos, -1), axis=1)      # (B,)
    last_idx = jnp.maximum(last_idx, 0)

    # gather the B selected rows in the wrapper; this (B, H) slab IS vec
    vec = hidden_states[jnp.arange(B), last_idx]                     # (B, H)

    logit = classification_head(vec, w_t, bias)                      # (B, C)
    return vec, logit


# ----------------------------- main ------------------------------------------
if __name__ == "__main__":
    key = jax.random.PRNGKey(0)
    k_ids, k_emb, k_w, k_b = jax.random.split(key, 4)

    # deterministic source_ids: random tokens in [3, VOCAB), exactly one eos
    # per row followed by pad tokens.
    ids = jax.random.randint(k_ids, (BATCH, MAX_SOURCE_LENGTH), 3, VOCAB,
                             dtype=jnp.int32)
    ids = ids.at[0, 5].set(EOS_TOKEN_ID)
    ids = ids.at[0, 6:].set(PAD_TOKEN_ID)
    ids = ids.at[1, 6].set(EOS_TOKEN_ID)
    ids = ids.at[1, 7:].set(PAD_TOKEN_ID)

    # deterministic "model" parameters
    embed_table = jax.random.normal(k_emb, (VOCAB, HIDDEN), jnp.float32) * 0.02
    # nn.Linear(hidden_size, num_class): torch weight is (C, H); store transposed.
    w_t = jax.random.normal(k_w, (HIDDEN, NUM_CLASS), jnp.float32) * 0.02
    bias = jax.random.normal(k_b, (1, NUM_CLASS), jnp.float32) * 0.02

    # host-side check (outside any traced code)
    validate_eos_counts(ids)

    fwd = jax.jit(codet5_classifier_forward)
    vec, logit = fwd(ids, embed_table, w_t, bias)
    jax.block_until_ready((vec, logit))

    # pure-JAX references
    hid_ref = embed_table[ids]
    last_idx_ref = jnp.max(
        jnp.where(ids == EOS_TOKEN_ID,
                  jnp.arange(MAX_SOURCE_LENGTH, dtype=jnp.int32)[None, :], -1),
        axis=1)
    vec_ref = hid_ref[jnp.arange(BATCH), last_idx_ref]
    # f32 reference (loose tol: kernel matmul operands are bf16, f32 accumulate)
    logit_ref_f32 = vec_ref @ w_t + bias
    # bf16-operand reference (matches kernel numerics)
    logit_ref_bf16 = (
        jnp.dot(vec_ref.astype(jnp.bfloat16), w_t.astype(jnp.bfloat16),
                preferred_element_type=jnp.float32) + bias
    )

    assert vec.shape == (BATCH, HIDDEN)
    assert logit.shape == (BATCH, NUM_CLASS)
    assert np.allclose(np.asarray(vec), np.asarray(vec_ref), atol=1e-6)
    assert np.allclose(np.asarray(logit), np.asarray(logit_ref_bf16), atol=1e-5)
    assert np.allclose(np.asarray(logit), np.asarray(logit_ref_f32), atol=5e-3)

    print("KERNEL_OK")
</pallas_src>

<mosaic_0001>
module attributes {stable_mosaic.version = 11 : i64} {
  func.func @_head_kernel(%arg0: i32, %arg1: memref<8x128xbf16, #tpu.memory_space<vmem>>, %arg2: memref<128x128xbf16, #tpu.memory_space<vmem>>, %arg3: memref<1x128xf32, #tpu.memory_space<vmem>>, %arg4: memref<8x128xf32, #tpu.memory_space<vmem>>) attributes {dimension_semantics = [#tpu.dimension_semantics<arbitrary>], iteration_bounds = array<i64: 1>, scalar_prefetch = 0 : i64, scratch_operands = 0 : i64, tpu.core_type = #tpu.core_type<tc>, window_params = [{transform_indices = @transform_0, window_bounds = array<i64: 8, 128>}, {pipeline_mode = #tpu.pipeline_mode<synchronous>, transform_indices = @transform_1, window_bounds = array<i64: 128, 128>}, {pipeline_mode = #tpu.pipeline_mode<synchronous>, transform_indices = @transform_2, window_bounds = array<i64: 1, 128>}, {transform_indices = @transform_3, window_bounds = array<i64: 8, 128>}]} {
    %c0 = arith.constant 0 : index
    %c0_0 = arith.constant 0 : index
    %0 = vector.load %arg1[%c0, %c0_0] : memref<8x128xbf16, #tpu.memory_space<vmem>>, vector<8x128xbf16>
    %c0_1 = arith.constant 0 : index
    %c0_2 = arith.constant 0 : index
    %1 = vector.load %arg2[%c0_1, %c0_2] : memref<128x128xbf16, #tpu.memory_space<vmem>>, vector<128x128xbf16>
    %cst = arith.constant dense<0.000000e+00> : vector<8x128xf32>
    %2 = tpu.matmul %0, %1, %cst {dimension_numbers = #tpu.dot_dimension_numbers<[1], [0], [0], [1], [0, 0, 1, 1], [], []>} : vector<8x128xbf16>, vector<128x128xbf16>, vector<8x128xf32> -> vector<8x128xf32>
    %c0_3 = arith.constant 0 : index
    %c0_4 = arith.constant 0 : index
    %3 = vector.load %arg3[%c0_3, %c0_4] : memref<1x128xf32, #tpu.memory_space<vmem>>, vector<1x128xf32>
    %4 = vector.broadcast %3 : vector<1x128xf32> to vector<8x128xf32>
    %5 = arith.addf %2, %4 : vector<8x128xf32>
    %c0_5 = arith.constant 0 : index
    %c0_6 = arith.constant 0 : index
    %6 = vector.load %arg4[%c0_5, %c0_6] : memref<8x128xf32, #tpu.memory_space<vmem>>, vector<8x128xf32>
    tpu.vector_store %arg4[%c0_5, %c0_6], %5 {strides = array<i32>} : memref<8x128xf32, #tpu.memory_space<vmem>>, vector<8x128xf32>,
    return
  }
  func.func @transform_0(%arg0: i32) -> (i32, i32) {
    %c0_i32 = arith.constant 0 : i32
    %c0_i32_0 = arith.constant 0 : i32
    return %arg0, %c0_i32 : i32, i32
  }
  func.func @transform_1(%arg0: i32) -> (i32, i32) {
    %c0_i32 = arith.constant 0 : i32
    %c0_i32_0 = arith.constant 0 : i32
    %c0_i32_1 = arith.constant 0 : i32
    return %c0_i32, %c0_i32_0 : i32, i32
  }
  func.func @transform_2(%arg0: i32) -> (i32, i32) {
    %c0_i32 = arith.constant 0 : i32
    %c0_i32_0 = arith.constant 0 : i32
    %c0_i32_1 = arith.constant 0 : i32
    return %c0_i32, %c0_i32_0 : i32, i32
  }
  func.func @transform_3(%arg0: i32) -> (i32, i32) {
    %c0_i32 = arith.constant 0 : i32
    %c0_i32_0 = arith.constant 0 : i32
    return %arg0, %c0_i32 : i32, i32
  }
}

</mosaic_0001>

<bundles_post_ra>
// kernel: codet5_classifier_forward.1
= control target key start
LH: loop header
LB: loop body
LE: loop exit
PB: predicated region body
PF: predicated region fallthrough
CT: control target
= control target key end

     0   :  { %v180_v0 = vmov 0.0   ;;  %vm181_vm0 = vmmov 0   ;;  %s235_s1 = inlined_call_operand.vmem [shape: bf16[128,128], index: 1, kind: input, shape index: {}]   ;;  %s236_s0 = inlined_call_operand.vmem [shape: bf16[8,128], index: 0, kind: input, shape index: {}]   ;;  %s237_s2 = inlined_call_operand.vmem [shape: f32[1,128], index: 2, kind: input, shape index: {}]   ;;  %s238_s3 = inlined_call_operand.vmem [shape: f32[8,128], index: 3, kind: output, shape index: {}]  }
   0x1   :  { %150 = vmatprep.subr.bf16.mxu0 %v180_v0  ;;  %v172_v1 = vld [vmem:[%s235_s1] sm:$0xff]   ;;  %166 = vmatprep.mubr.msk.bf16.mxu0 %vm181_vm0, %v180_v0  ;;  %v173_v2 = vld [vmem:[%s235_s1 + $0x8] sm:$0xff]   ;;  %v174_v3 = vld [vmem:[%s235_s1 + $0x10] sm:$0xff]  }
   0x2   :  { %151 = vmatpush3.bf16.msra.mxu0 %v172_v1  ;;  %v175_v4 = vld [vmem:[%s235_s1 + $0x18] sm:$0xff]   ;;  %v176_v5 = vld [vmem:[%s235_s1 + $0x20] sm:$0xff]   ;;  %v177_v6 = vld [vmem:[%s235_s1 + $0x28] sm:$0xff]  }
   0x3   :  { %152 = vmatprep.subr.bf16.mxu0 %v180_v0  ;;  %v178_v7 = vld [vmem:[%s235_s1 + $0x30] sm:$0xff]   ;;  %v179_v8 = vld [vmem:[%s235_s1 + $0x38] sm:$0xff]   ;;  %v15_v9 = vld [vmem:[%s236_s0] sm:$0xf] }
   0x4   :  { %v132_v10 = vld [vmem:[%s237_s2] ss:$0 sm:$0xff] }
   0x6   :  { %153 = vmatpush3.bf16.msra.mxu0 %v173_v2 }
   0x7   :  { %154 = vmatprep.subr.bf16.mxu0 %v180_v0 }
   0xa   :  { %155 = vmatpush3.bf16.msra.mxu0 %v174_v3 }
   0xb   :  { %156 = vmatprep.subr.bf16.mxu0 %v180_v0 }
   0xe   :  { %157 = vmatpush3.bf16.msra.mxu0 %v175_v4 }
   0xf   :  { %158 = vmatprep.subr.bf16.mxu0 %v180_v0 }
  0x12   :  { %159 = vmatpush3.bf16.msra.mxu0 %v176_v5 }
  0x13   :  { %160 = vmatprep.subr.bf16.mxu0 %v180_v0 }
  0x16   :  { %161 = vmatpush3.bf16.msra.mxu0 %v177_v6 }
  0x17   :  { %162 = vmatprep.subr.bf16.mxu0 %v180_v0 }
  0x1a   :  { %163 = vmatpush3.bf16.msra.mxu0 %v178_v7 }
  0x1b   :  { %164 = vmatprep.subr.bf16.mxu0 %v180_v0 }
  0x1e   :  { %165 = vmatpush3.bf16.msra.mxu0 %v179_v8 }
  0x21   :  { %167 = vmatmul.mubr.bf16.vlgmr.msra.gmra.mrb[0].mxu0 %v15_v9 }
  0xf4   :  { %v121_v11 = vpop.f32.mrb[0].mxu0 }
  0xf5   :  { %v122_v12 = vadd.f32 %v132_v10, %v121_v11  ;;  %v168_v13 = vpop.f32.mrb[1].mxu0 }
  0xf6   :  { %v124_v14 = vpop.f32.mrb[2].mxu0 }
  0xf7   :  { %127 = vst [vmem:[%s238_s3] sm:$0xff] %v122_v12  ;;  %v169_v15 = vpop.f32.mrb[3].mxu0 }

</bundles_post_ra>
